<compile_context>
chip_gen: v7x
topology: tpu7x:2x2x1
jax: 0.10.0
libtpu: 0.0.40
codegen_flags: <defaults>
</compile_context>

<pallas_src>
import functools

import jax
import jax.numpy as jnp
from jax.experimental import pallas as pl
from jax.experimental.pallas import tpu as pltpu

NEG = -1e9                      # additive "masked" score (avoids -inf NaN corner cases)
LN_EPS = 1e-5                   # PyTorch LayerNorm default
GELU_C = 0.7978845608028654     # sqrt(2/pi)
_VMEM_LIMIT = 32 * 1024 * 1024  # explicit scoped-VMEM budget, safe on v5e/v6e/v7x


def _pick_tile(n, candidates=(256, 128)):
    """Largest MXU/lane-friendly tile dividing n, else the full dim (always legal)."""
    # TODO(synk): pad / pl.cdiv + masked stores for dims not divisible by a lane tile.
    for c in candidates:
        if n % c == 0:
            return c
    return n


# ------------------------------ LayerNorm kernel ------------------------------

def _ln_kernel(x_ref, g_ref, b_ref, o_ref):
    x = x_ref[...].astype(jnp.float32)
    mu = jnp.mean(x, axis=-1, keepdims=True)
    var = jnp.mean(jnp.square(x - mu), axis=-1, keepdims=True)
    xn = (x - mu) * jax.lax.rsqrt(var + LN_EPS)
    o_ref[...] = (xn * g_ref[...].astype(jnp.float32)
                  + b_ref[...].astype(jnp.float32)).astype(o_ref.dtype)


def layernorm(x2d, gamma, beta):
    """Row-tiled LayerNorm; computed once per row (never re-run per output-col tile)."""
    n, d = x2d.shape
    tm = _pick_tile(n, (512, 256, 128))
    return pl.pallas_call(
        _ln_kernel,
        out_shape=jax.ShapeDtypeStruct((n, d), x2d.dtype),
        grid=(n // tm,),
        in_specs=[pl.BlockSpec((tm, d), lambda i: (i, 0)),
                  pl.BlockSpec((1, d), lambda i: (0, 0)),
                  pl.BlockSpec((1, d), lambda i: (0, 0))],
        out_specs=pl.BlockSpec((tm, d), lambda i: (i, 0)),
        compiler_params=pltpu.CompilerParams(
            dimension_semantics=("parallel",),
            vmem_limit_bytes=_VMEM_LIMIT),
    )(x2d, gamma.reshape(1, d), beta.reshape(1, d))


# ----------------------- generic K-tiled matmul kernel ------------------------

def _matmul_kernel(has_bias, act, has_res, *refs):
    """acc += x_blk @ w_blk over grid axis 2; bias/GELU/residual/store at the last step."""
    it = iter(refs)
    x_ref = next(it)
    w_ref = next(it)
    bias_ref = next(it) if has_bias else None
    res_ref = next(it) if has_res else None
    o_ref = next(it)
    acc_ref = next(it)

    k = pl.program_id(2)

    @pl.when(k == 0)
    def _():
        acc_ref[...] = jnp.zeros_like(acc_ref)

    acc_ref[...] += jnp.dot(x_ref[...], w_ref[...],
                            preferred_element_type=jnp.float32)

    @pl.when(k == pl.num_programs(2) - 1)
    def _():
        acc = acc_ref[...]
        if has_bias:
            acc = acc + bias_ref[...].astype(jnp.float32)
        if act == "gelu":  # GELU(approximate='tanh')
            acc = 0.5 * acc * (1.0 + jnp.tanh(GELU_C * (acc + 0.044715 * acc * acc * acc)))
        if has_res:
            acc = acc + res_ref[...].astype(jnp.float32)
        o_ref[...] = acc.astype(o_ref.dtype)


def linear(x2d, w, *, bias=None, residual=None, act=None):
    """out = [residual +] act( x @ w [+ bias] ), tiled over (rows, cols, K)."""
    n, kdim = x2d.shape
    nout = w.shape[1]
    tm = _pick_tile(n)
    tn = _pick_tile(nout)
    tk = _pick_tile(kdim, (512, 256, 128))
    has_bias = bias is not None
    has_res = residual is not None

    args = [x2d, w]
    in_specs = [pl.BlockSpec((tm, tk), lambda i, j, k: (i, k)),
                pl.BlockSpec((tk, tn), lambda i, j, k: (k, j))]
    if has_bias:
        args.append(bias.reshape(1, nout))
        in_specs.append(pl.BlockSpec((1, tn), lambda i, j, k: (0, j)))
    if has_res:
        args.append(residual)
        in_specs.append(pl.BlockSpec((tm, tn), lambda i, j, k: (i, j)))

    kern = functools.partial(_matmul_kernel, has_bias, act, has_res)
    return pl.pallas_call(
        kern,
        out_shape=jax.ShapeDtypeStruct((n, nout), x2d.dtype),
        grid=(n // tm, nout // tn, kdim // tk),
        in_specs=in_specs,
        out_specs=pl.BlockSpec((tm, tn), lambda i, j, k: (i, j)),
        scratch_shapes=[pltpu.VMEM((tm, tn), jnp.float32)],
        compiler_params=pltpu.CompilerParams(
            dimension_semantics=("parallel", "parallel", "arbitrary"),
            vmem_limit_bytes=_VMEM_LIMIT),
    )(*args)


def head_linear(x2d, w_hkd):
    """x: (N, K), w: (H, K, hd) -> (H, N, hd).
    Per-head Q/K/V projection written directly head-major: no XLA transpose, no jnp.split."""
    n, kdim = x2d.shape
    H, _, hd = w_hkd.shape
    tm = _pick_tile(n)
    tk = _pick_tile(kdim, (512, 256, 128))

    kern = functools.partial(_matmul_kernel, False, None, False)
    return pl.pallas_call(
        kern,
        out_shape=jax.ShapeDtypeStruct((H, n, hd), x2d.dtype),
        grid=(n // tm, H, kdim // tk),
        in_specs=[pl.BlockSpec((tm, tk), lambda i, j, k: (i, k)),
                  pl.BlockSpec((None, tk, hd), lambda i, j, k: (j, k, 0))],
        out_specs=pl.BlockSpec((None, tm, hd), lambda i, j, k: (j, i, 0)),
        scratch_shapes=[pltpu.VMEM((tm, hd), jnp.float32)],
        compiler_params=pltpu.CompilerParams(
            dimension_semantics=("parallel", "parallel", "arbitrary"),
            vmem_limit_bytes=_VMEM_LIMIT),
    )(x2d, w_hkd)


def head_out_linear(a_hnd, w_hdo, residual):
    """a: (H, N, hd), w: (H, hd, Dout), residual: (N, Dout) -> (N, Dout).
    The head-merge is fused into the reduction: grid K axis == heads (no transpose)."""
    H, n, hd = a_hnd.shape
    nout = w_hdo.shape[2]
    tm = _pick_tile(n)
    tn = _pick_tile(nout)

    kern = functools.partial(_matmul_kernel, False, None, True)
    return pl.pallas_call(
        kern,
        out_shape=jax.ShapeDtypeStruct((n, nout), a_hnd.dtype),
        grid=(n // tm, nout // tn, H),
        in_specs=[pl.BlockSpec((None, tm, hd), lambda i, j, k: (k, i, 0)),
                  pl.BlockSpec((None, hd, tn), lambda i, j, k: (k, 0, j)),
                  pl.BlockSpec((tm, tn), lambda i, j, k: (i, j))],
        out_specs=pl.BlockSpec((tm, tn), lambda i, j, k: (i, j)),
        scratch_shapes=[pltpu.VMEM((tm, tn), jnp.float32)],
        compiler_params=pltpu.CompilerParams(
            dimension_semantics=("parallel", "parallel", "arbitrary"),
            vmem_limit_bytes=_VMEM_LIMIT),
    )(a_hnd, w_hdo, residual)


# ----------------------- flash-style attention kernel ------------------------

def _attn_kernel(scale, causal, tq, tkv,
                 q_ref, k_ref, v_ref, km_ref, o_ref, m_sc, l_sc, acc_sc):
    qi = pl.program_id(1)
    ki = pl.program_id(2)

    @pl.when(ki == 0)
    def _():
        m_sc[...] = jnp.full_like(m_sc, -1e30)
        l_sc[...] = jnp.zeros_like(l_sc)
        acc_sc[...] = jnp.zeros_like(acc_sc)

    def update():
        q = q_ref[...]                                    # (tq, hd)  bf16
        k = k_ref[...]                                    # (tkv, hd) bf16
        v = v_ref[...]                                    # (tkv, hd) bf16
        # scores: contract last dims directly (no k.T materialization)
        s = jax.lax.dot_general(q, k, (((1,), (1,)), ((), ())),
                                preferred_element_type=jnp.float32) * scale
        keep = km_ref[...] > 0.0                          # (1, tkv) key-padding mask
        if causal:
            rows = qi * tq + jax.lax.broadcasted_iota(jnp.int32, (tq, tkv), 0)
            cols = ki * tkv + jax.lax.broadcasted_iota(jnp.int32, (tq, tkv), 1)
            keep = keep & (cols <= rows)
        s = jnp.where(keep, s, NEG)

        # online softmax update
        m_prev = m_sc[...]
        m_new = jnp.maximum(m_prev, jnp.max(s, axis=-1, keepdims=True))
        alpha = jnp.exp(m_prev - m_new)
        p = jnp.exp(s - m_new)
        l_sc[...] = alpha * l_sc[...] + jnp.sum(p, axis=-1, keepdims=True)
        acc_sc[...] = alpha * acc_sc[...] + jnp.dot(p.astype(v.dtype), v,
                                                    preferred_element_type=jnp.float32)
        m_sc[...] = m_new

    if causal:
        # skip KV blocks entirely above the causal diagonal (~2x fewer self-attn FLOPs)
        @pl.when(ki * tkv <= qi * tq + (tq - 1))
        def _():
            update()
    else:
        update()

    @pl.when(ki == pl.num_programs(2) - 1)
    def _():
        o_ref[...] = (acc_sc[...] *
                      pl.reciprocal(l_sc[...], approx=True)).astype(o_ref.dtype)


def attention(q, k, v, key_mask_b1s, B, T, S, causal):
    """q: (H, B*T, hd), k/v: (H, B*S, hd), key_mask: (B,1,S) float (1 = keep).
    Returns (H, B*T, hd). Grid (B*H, Tq, Skv) with the kv axis last ('arbitrary')."""
    H, _, hd = q.shape
    tq = _pick_tile(T)
    tkv = _pick_tile(S)
    qpb = T // tq          # q row-tiles per batch
    kpb = S // tkv         # kv row-tiles per batch
    scale = 1.0 / float(hd) ** 0.5

    kern = functools.partial(_attn_kernel, scale, causal, tq, tkv)
    return pl.pallas_call(
        kern,
        out_shape=jax.ShapeDtypeStruct((H, B * T, hd), q.dtype),
        grid=(B * H, qpb, kpb),
        in_specs=[
            pl.BlockSpec((None, tq, hd),
                         lambda bh, qi, ki: (bh % H, (bh // H) * qpb + qi, 0)),
            pl.BlockSpec((None, tkv, hd),
                         lambda bh, qi, ki: (bh % H, (bh // H) * kpb + ki, 0)),
            pl.BlockSpec((None, tkv, hd),
                         lambda bh, qi, ki: (bh % H, (bh // H) * kpb + ki, 0)),
            pl.BlockSpec((None, 1, tkv), lambda bh, qi, ki: (bh // H, 0, ki)),
        ],
        out_specs=pl.BlockSpec((None, tq, hd),
                               lambda bh, qi, ki: (bh % H, (bh // H) * qpb + qi, 0)),
        scratch_shapes=[pltpu.VMEM((tq, 1), jnp.float32),
                        pltpu.VMEM((tq, 1), jnp.float32),
                        pltpu.VMEM((tq, hd), jnp.float32)],
        compiler_params=pltpu.CompilerParams(
            dimension_semantics=("parallel", "parallel", "arbitrary"),
            vmem_limit_bytes=_VMEM_LIMIT),
    )(q, k, v, key_mask_b1s)


# ------------------------------ model glue (JAX) -----------------------------

def init_decoder_params(key, n_blocks, emb_dim, n_heads, dtype=jnp.bfloat16):
    D, H = emb_dim, n_heads
    hd = D // H
    params = []
    for i in range(n_blocks):
        keys = jax.random.split(jax.random.fold_in(key, i), 10)
        s = 0.02

        def w(k, shape):
            return (s * jax.random.normal(k, shape)).astype(dtype)

        params.append(dict(
            ln1_g=jnp.ones((D,), dtype), ln1_b=jnp.zeros((D,), dtype),
            ln2_g=jnp.ones((D,), dtype), ln2_b=jnp.zeros((D,), dtype),
            ln3_g=jnp.ones((D,), dtype), ln3_b=jnp.zeros((D,), dtype),
            # attention projection weights stored head-major (bias=False, as in the module)
            sa_wq=w(keys[0], (H, D, hd)), sa_wk=w(keys[1], (H, D, hd)),
            sa_wv=w(keys[2], (H, D, hd)), sa_wo=w(keys[3], (H, hd, D)),
            ca_wq=w(keys[4], (H, D, hd)), ca_wk=w(keys[5], (H, D, hd)),
            ca_wv=w(keys[6], (H, D, hd)), ca_wo=w(keys[7], (H, hd, D)),
            ffn_w1=w(keys[8], (D, 4 * D)), ffn_b1=jnp.zeros((4 * D,), dtype),
            ffn_w2=w(keys[9], (4 * D, D)), ffn_b2=jnp.zeros((D,), dtype),
        ))
    return params


def decoder_block_forward(p, src, x, tgt_km, src_km, n_heads):
    B, T, D = x.shape
    S = src.shape[1]

    x2 = x.reshape(B * T, D)
    src2 = src.reshape(B * S, D)

    # --- causal self-attention:  x = x + Wo(Attn(Wq,k,v(LN1(x)))) ---
    xn = layernorm(x2, p['ln1_g'], p['ln1_b'])
    q = head_linear(xn, p['sa_wq'])
    k = head_linear(xn, p['sa_wk'])
    v = head_linear(xn, p['sa_wv'])
    a = attention(q, k, v, tgt_km, B, T, T, causal=True)          # (H, B*T, hd)
    x2 = head_out_linear(a, p['sa_wo'], x2)

    # --- cross-attention: x = x + Wo(Attn(Wq(LN2(x)), Wk,v(LN2(src)))) ---
    xn = layernorm(x2, p['ln2_g'], p['ln2_b'])
    srcn = layernorm(src2, p['ln2_g'], p['ln2_b'])
    q = head_linear(xn, p['ca_wq'])
    k = head_linear(srcn, p['ca_wk'])
    v = head_linear(srcn, p['ca_wv'])
    a = attention(q, k, v, src_km, B, T, S, causal=False)
    x2 = head_out_linear(a, p['ca_wo'], x2)

    # --- feed-forward: x = x + W2(GELU(W1(LN3(x)) + b1)) + b2 ---
    xn = layernorm(x2, p['ln3_g'], p['ln3_b'])
    h = linear(xn, p['ffn_w1'], bias=p['ffn_b1'], act='gelu')
    # TODO(synk): optional FFN1+FFN2 fusion keeping the (tm, 4D) hidden tile in VMEM (v6e).
    x2 = linear(h, p['ffn_w2'], bias=p['ffn_b2'], residual=x2)

    return x2.reshape(B, T, D)


def transformer_decoder_forward(params, src, tgt, src_mask, tgt_mask, n_heads,
                                compute_dtype=jnp.bfloat16):
    """src: (B,S,D), tgt: (B,T,D), src_mask: (B,S), tgt_mask: (B,T) (1 = valid)."""
    B, T, _ = tgt.shape
    S = src.shape[1]
    x = tgt.astype(compute_dtype)
    src_c = src.astype(compute_dtype)
    tgt_km = tgt_mask.astype(jnp.float32).reshape(B, 1, T)   # tiny key-masks, used in-kernel
    src_km = src_mask.astype(jnp.float32).reshape(B, 1, S)
    for p in params:
        x = decoder_block_forward(p, src_c, x, tgt_km, src_km, n_heads)
    return x


# --------------------------------- driver ------------------------------------

if __name__ == "__main__":
    B, T, S, D, H, N_BLOCKS = 2, 8, 8, 32, 4, 2

    key = jax.random.PRNGKey(0)
    k1, k2, k3 = jax.random.split(key, 3)
    src = jax.random.normal(k1, (B, S, D), jnp.float32)
    tgt = jax.random.normal(k2, (B, T, D), jnp.float32)
    src_mask = jnp.array([[1] * 8, [1] * 6 + [0] * 2], jnp.int32)   # (B, S) padding mask
    tgt_mask = jnp.ones((B, T), jnp.int32)                          # (B, T)

    params = init_decoder_params(k3, N_BLOCKS, D, H)

    out = transformer_decoder_forward(params, src, tgt, src_mask, tgt_mask, H)
    out = jax.block_until_ready(out)

    assert out.shape == (B, T, D), out.shape
    assert bool(jnp.all(jnp.isfinite(out.astype(jnp.float32))))
    print("KERNEL_OK")
</pallas_src>

<mosaic_0001>
module attributes {stable_mosaic.version = 11 : i64} {
  func.func @_ln_kernel(%arg0: i32, %arg1: memref<16x32xbf16, #tpu.memory_space<vmem>>, %arg2: memref<1x32xbf16, #tpu.memory_space<vmem>>, %arg3: memref<1x32xbf16, #tpu.memory_space<vmem>>, %arg4: memref<16x32xbf16, #tpu.memory_space<vmem>>) attributes {dimension_semantics = [#tpu.dimension_semantics<parallel>], iteration_bounds = array<i64: 1>, scalar_prefetch = 0 : i64, scratch_operands = 0 : i64, tpu.core_type = #tpu.core_type<tc>, window_params = [{transform_indices = @transform_0, window_bounds = array<i64: 16, 32>}, {pipeline_mode = #tpu.pipeline_mode<synchronous>, transform_indices = @transform_1, window_bounds = array<i64: 1, 32>}, {pipeline_mode = #tpu.pipeline_mode<synchronous>, transform_indices = @transform_2, window_bounds = array<i64: 1, 32>}, {transform_indices = @transform_3, window_bounds = array<i64: 16, 32>}]} {
    %c0 = arith.constant 0 : index
    %c0_0 = arith.constant 0 : index
    %0 = vector.load %arg1[%c0, %c0_0] : memref<16x32xbf16, #tpu.memory_space<vmem>>, vector<16x32xbf16>
    %1 = arith.extf %0 : vector<16x32xbf16> to vector<16x32xf32>
    %cst = arith.constant dense<0.000000e+00> : vector<16xf32>
    %2 = vector.multi_reduction <add>, %1, %cst [1] : vector<16x32xf32> to vector<16xf32>
    %3 = vector.shape_cast %2 : vector<16xf32> to vector<16x1xf32>
    %cst_1 = arith.constant 3.200000e+01 : f32
    %4 = vector.broadcast %cst_1 : f32 to vector<16x1xf32>
    %5 = arith.divf %3, %4 : vector<16x1xf32>
    %6 = vector.broadcast %5 : vector<16x1xf32> to vector<16x32xf32>
    %7 = arith.subf %1, %6 : vector<16x32xf32>
    %8 = arith.mulf %7, %7 : vector<16x32xf32>
    %cst_2 = arith.constant dense<0.000000e+00> : vector<16xf32>
    %9 = vector.multi_reduction <add>, %8, %cst_2 [1] : vector<16x32xf32> to vector<16xf32>
    %10 = vector.shape_cast %9 : vector<16xf32> to vector<16x1xf32>
    %cst_3 = arith.constant 3.200000e+01 : f32
    %11 = vector.broadcast %cst_3 : f32 to vector<16x1xf32>
    %12 = arith.divf %10, %11 : vector<16x1xf32>
    %13 = vector.broadcast %5 : vector<16x1xf32> to vector<16x32xf32>
    %14 = arith.subf %1, %13 : vector<16x32xf32>
    %cst_4 = arith.constant 9.99999974E-6 : f32
    %15 = vector.broadcast %cst_4 : f32 to vector<16x1xf32>
    %16 = arith.addf %12, %15 : vector<16x1xf32>
    %17 = math.rsqrt %16 : vector<16x1xf32>
    %18 = vector.broadcast %17 : vector<16x1xf32> to vector<16x32xf32>
    %19 = arith.mulf %14, %18 : vector<16x32xf32>
    %c0_5 = arith.constant 0 : index
    %c0_6 = arith.constant 0 : index
    %20 = vector.load %arg2[%c0_5, %c0_6] : memref<1x32xbf16, #tpu.memory_space<vmem>>, vector<1x32xbf16>
    %21 = arith.extf %20 : vector<1x32xbf16> to vector<1x32xf32>
    %22 = vector.broadcast %21 : vector<1x32xf32> to vector<16x32xf32>
    %23 = arith.mulf %19, %22 : vector<16x32xf32>
    %c0_7 = arith.constant 0 : index
    %c0_8 = arith.constant 0 : index
    %24 = vector.load %arg3[%c0_7, %c0_8] : memref<1x32xbf16, #tpu.memory_space<vmem>>, vector<1x32xbf16>
    %25 = arith.extf %24 : vector<1x32xbf16> to vector<1x32xf32>
    %26 = vector.broadcast %25 : vector<1x32xf32> to vector<16x32xf32>
    %27 = arith.addf %23, %26 : vector<16x32xf32>
    %28 = arith.truncf %27 : vector<16x32xf32> to vector<16x32xbf16>
    %c0_9 = arith.constant 0 : index
    %c0_10 = arith.constant 0 : index
    %29 = vector.load %arg4[%c0_9, %c0_10] : memref<16x32xbf16, #tpu.memory_space<vmem>>, vector<16x32xbf16>
    tpu.vector_store %arg4[%c0_9, %c0_10], %28 {strides = array<i32>} : memref<16x32xbf16, #tpu.memory_space<vmem>>, vector<16x32xbf16>,
    return
  }
  func.func @transform_0(%arg0: i32) -> (i32, i32) {
    %c0_i32 = arith.constant 0 : i32
    %c0_i32_0 = arith.constant 0 : i32
    return %arg0, %c0_i32 : i32, i32
  }
  func.func @transform_1(%arg0: i32) -> (i32, i32) {
    %c0_i32 = arith.constant 0 : i32
    %c0_i32_0 = arith.constant 0 : i32
    %c0_i32_1 = arith.constant 0 : i32
    return %c0_i32, %c0_i32_0 : i32, i32
  }
  func.func @transform_2(%arg0: i32) -> (i32, i32) {
    %c0_i32 = arith.constant 0 : i32
    %c0_i32_0 = arith.constant 0 : i32
    %c0_i32_1 = arith.constant 0 : i32
    return %c0_i32, %c0_i32_0 : i32, i32
  }
  func.func @transform_3(%arg0: i32) -> (i32, i32) {
    %c0_i32 = arith.constant 0 : i32
    %c0_i32_0 = arith.constant 0 : i32
    return %arg0, %c0_i32 : i32, i32
  }
}

</mosaic_0001>

<bundles_post_ra>
// kernel: tpu_custom_call.1
= control target key start
LH: loop header
LB: loop body
LE: loop exit
PB: predicated region body
PF: predicated region fallthrough
CT: control target
= control target key end

     0   :  { %8 = vsyncpa [#allocation3], 0  ;;  %s233_s0 = inlined_call_operand.hbm [shape: bf16[16,32], index: 0, kind: input, shape index: {}]   ;;  %s234_s1 = inlined_call_operand.vmem [shape: bf16[1,32], index: 1, kind: input, shape index: {}]   ;;  %s235_s2 = inlined_call_operand.vmem [shape: bf16[1,32], index: 2, kind: input, shape index: {}]   ;;  %s236_s3 = inlined_call_operand.hbm [shape: bf16[16,32], index: 3, kind: output, shape index: {}]  }
   0x1   :  { %9 = vsyncpa [#allocation4], 0  ;;  %s169_s12 = smov [#allocation2]   ;;  %s121_s16 = scalar_lea.hbm %s233_s0, 128 }
   0x2   :  { %s15_s13 = sshll.u32 %s169_s12, 4  ;;  %p122_p0 = scmp.ne.s32.totalorder %s233_s0, %s121_s16  ;;  %s16_s13 = int_to_ptr.vmem [resolvable:$true] %s15_s13 }
   0x3   :  { %p125_p1 = scmp.lt.u32.totalorder %s121_s16, %s233_s0 }
   0x5   :  { %p127_p2 = pnand %p125_p1, %p122_p0 }
   0x7   :  { %130 = shalt.err (!%p127_p2)
}
   0x8   :  { %s131_s21 = scalar_lea.vmem %s16_s13, 128  ;;  %p136_p4 = scmp.lt.s32.totalorder %s16_s13, %s16_s13 }
   0x9   :  { %p132_p3 = scmp.ne.s32.totalorder %s16_s13, %s131_s21  ;;  %p137_p5 = scmp.lt.s32.totalorder %s131_s21, %s131_s21 }
   0xb   :  { %p138_p6 = por %p137_p5, %p136_p4 }
   0xd   :  { %p139_p7 = pnand %p138_p6, %p132_p3 }
   0xf   :  { %142 = shalt.err (!%p139_p7)
}
  0x10   :  { %s170_s22 = smov 64   ;;  %s171_s23 = smov 4  }
  0x11   :  { %21 = dma.hbm_to_vmem [thread:$0]  %s233_s0, 128, %s16_s13, [#allocation3], %s170_s22, %s170_s22, %s171_s23  }
  0x12   :  { %165 = dma.done.wait [#allocation3], 128  }
  0x13   :  { %166 = vsyncadd [#allocation3], 4294967168  ;;  %v110_v0 = vld [vmem:[#allocation2] sm:$0xff]   ;;  %vm33_vm0 = vcmask 261120   ;;  %v63_v17 = vlaneseq  ;;  %vm85_vm1 = vcmask 257024  }
  0x14   :  { %v111_v1 = vunpack.c.l.bf16 %v110_v0  ;;  %v112_v2 = vunpack.c.h.bf16 %v110_v0  ;;  %v61_v23 = vld [vmem:[%s234_s1] sm:$0x1]  ;;  %s172_s1 = smov [#allocation5]  }
  0x15   :  { %v64_v21 = vshrl.u32 %v63_v17, 7  ;;  %v69_v24 = vld [vmem:[%s235_s2] sm:$0x1]  ;;  %v62_v25 = vunpack.c.l.bf16 %v61_v23  ;;  %s93_s29 = sshll.u32 %s172_s1, 4  ;;  %s94_s29 = int_to_ptr.vmem [resolvable:$true] %s93_s29 }
  0x16   :  { %v34_v3 = vsel %vm33_vm0, %v111_v1, 0.0  ;;  %v37_v4 = vsel %vm33_vm0, %v112_v2, 0.0  ;;  %v70_v27 = vunpack.c.l.bf16 %v69_v24  ;;  %s143_s2 = scalar_lea.vmem %s94_s29, 128  ;;  %p148_p9 = scmp.lt.s32.totalorder %s94_s29, %s94_s29 }
  0x17   :  { %35 = vadd.xlane.f32.xlu0 %v34_v3  ;;  %v65_v26 = vsub.s32 0, %v64_v21  ;;  %p144_p8 = scmp.ne.s32.totalorder %s94_s29, %s143_s2  ;;  %p149_p10 = scmp.lt.s32.totalorder %s143_s2, %s143_s2 }
  0x19   :  { %v66_v28 = vrot.slane %v62_v25, %v65_v26  ;;  %v74_v31 = vrot.slane %v70_v27, %v65_v26  ;;  %p150_p11 = por %p149_p10, %p148_p9 }
  0x1b   :  { %38 = vadd.xlane.f32.xlu0 %v37_v4  ;;  %p151_p12 = pnand %p150_p11, %p144_p8 }
  0xa4   :  { %v36_v5 = vpop.xlane.xlu0 %35 }
  0xa5   :  { %v41_v6 = vmul.f32 0.03125, %v36_v5 }
  0xa7   :  { %v43_v7 = vsub.f32 %v111_v1, %v41_v6 }
  0xa8   :  { %v39_v8 = vpop.xlane.xlu0 %38 }
  0xa9   :  { %v42_v9 = vmul.f32 0.03125, %v39_v8  ;;  %v45_v10 = vmul.f32 %v43_v7, %v43_v7 }
  0xab   :  { %v44_v11 = vsub.f32 %v112_v2, %v42_v9  ;;  %v47_v12 = vsel %vm33_vm0, %v45_v10, 0.0 }
  0xac   :  { %48 = vadd.xlane.f32.xlu1 %v47_v12 }
  0xad   :  { %v46_v13 = vmul.f32 %v44_v11, %v44_v11 }
  0xaf   :  { %v50_v14 = vsel %vm33_vm0, %v46_v13, 0.0 }
  0xb0   :  { %51 = vadd.xlane.f32.xlu1 %v50_v14 }
 0x139   :  { %v49_v15 = vpop.xlane.xlu1 %48 }
 0x13a   :  { %v53_v16 = vmul.f32 0.03125, %v49_v15 }
 0x13c   :  { %v55_v18 = vadd.f32 1e-05, %v53_v16 }
 0x13d   :  { %v52_v19 = vpop.xlane.xlu1 %51 }
 0x13e   :  { %117 = vrsqrt.f32 %v55_v18  ;;  %v54_v20 = vmul.f32 0.03125, %v52_v19 }
 0x140   :  { %v56_v22 = vadd.f32 1e-05, %v54_v20 }
 0x142   :  { %119 = vrsqrt.f32 %v56_v22 }
 0x148   :  { %v118_v29 = vpop.eup %117 }
 0x149   :  { %v59_v30 = vmul.f32 %v118_v29, %v43_v7 }
 0x14b   :  { %v67_v32 = vmul.f32 %v66_v28, %v59_v30 }
 0x14c   :  { %v120_v33 = vpop.eup %119 }
 0x14d   :  { %v60_v34 = vmul.f32 %v120_v33, %v44_v11  ;;  %v75_v35 = vadd.f32 %v74_v31, %v67_v32 }
 0x14f   :  { %v68_v36 = vmul.f32 %v66_v28, %v60_v34  ;;  %v107_v37 = vpack.c.bf16 %v75_v35, %v75_v35 }
 0x151   :  { %v76_v38 = vadd.f32 %v74_v31, %v68_v36  ;;  %86 = vst.msk [vmem:[#allocation5] sm:$0xf] %vm85_vm1, %v107_v37 }
 0x153   :  { %v108_v39 = vpack.c.bf16 %v76_v38, %v76_v38 }
 0x155   :  { %87 = vst.msk [vmem:[#allocation5 + $0x4] sm:$0xf] %vm85_vm1, %v108_v39 }
 0x156   :  { %154 = shalt.err (!%p151_p12)
}
 0x157   :  { %s155_s5 = scalar_lea.hbm %s236_s3, 128 }
 0x158   :  { %p156_p13 = scmp.ne.s32.totalorder %s236_s3, %s155_s5  ;;  %p159_p0 = scmp.lt.u32.totalorder %s155_s5, %s236_s3 }
 0x15a   :  { %p161_p1 = pnand %p159_p0, %p156_p13 }
 0x15c   :  { %164 = shalt.err (!%p161_p1)
}
 0x15d   :  { %99 = dma.vmem_to_hbm [thread:$0]  %s94_s29, 128, %s236_s3, [#allocation4], %s170_s22, %s170_s22, %s171_s23  }
 0x15e   :  { %167 = dma.done.wait [#allocation4], 128  }
 0x15f   :  { %168 = vsyncadd [#allocation4], 4294967168 }
 0x160   :  { %103 = vsyncpa [#allocation3], 1 }
 0x161   :  { %104 = vsyncpa [#allocation4], 1 }

</bundles_post_ra>
